<compile_context>
chip_gen: v7x
topology: tpu7x:2x2x1
jax: 0.10.0
libtpu: 0.0.40
codegen_flags: <defaults>
</compile_context>

<pallas_src>
import math

import jax
import jax.numpy as jnp
from jax import lax
from jax.experimental import pallas as pl
from jax.experimental.pallas import tpu as pltpu

BATCH = 2
SEQ = 8
HIDDEN = 32
NUM_HEADS = 4
HEAD_DIM = HIDDEN // NUM_HEADS


def _make_kernel(batch, seq, hidden, num_heads, head_dim):
    B, S, H, nh, d = batch, seq, hidden, num_heads, head_dim
    BS = B * S          # rows of the activation block
    GS = nh * BS        # rows of the per-(head,batch,seq) stacked workspace

    def kernel(x_ref, wqkvT_ref, bqkv_ref, selmask_ref, amask_ref,
               woT_ref, bo_ref, o_ref):
        # x_ref      : (BS, H)    activations, batch folded into rows
        # wqkvT_ref  : (H, 3H)    fused [Wq*scale | Wk | Wv]^T   (f32)
        # bqkv_ref   : (1, 3H)    fused [bq*scale | bk | bv]     (f32)
        # selmask_ref: (GS, 3H)   0/1 head-column selector
        # amask_ref  : (GS, GS)   additive mask (0 / -1e30)
        # woT_ref    : (H, H)     out_proj.weight^T, bf16
        # bo_ref     : (1, H)     out_proj bias
        # o_ref      : (BS, H)    output

        # 1) Fused QKV projection: ONE MXU matmul (kept in f32).
        qkv = jnp.dot(x_ref[...], wqkvT_ref[...],
                      preferred_element_type=jnp.float32) + bqkv_ref[...]   # (BS,3H)

        # 2) Head handling without lane shuffles: replicate the rows once per
        #    head (rows ordered (head, batch, seq)) and keep only the owning
        #    head's k/v columns via one precomputed selector multiply.
        qkv_rep = jnp.concatenate([qkv] * nh, axis=0)                        # (GS,3H)
        qkv_sel = qkv_rep * selmask_ref[...]                                 # (GS,3H)
        q = qkv_sel[:, :H]          # selector is 1 on q columns -> untouched
        k = qkv_sel[:, H:2 * H]     # only columns of head (row // BS) survive
        v = qkv_sel[:, 2 * H:]

        # 3) Scores for every (batch, head) pair in ONE MXU call
        #    (bf16 operands, f32 accumulation).  Cross-head / cross-batch
        #    entries are removed by the precomputed additive mask.
        s = lax.dot_general(q.astype(jnp.bfloat16), k.astype(jnp.bfloat16),
                            (((1,), (1,)), ((), ())),
                            preferred_element_type=jnp.float32)              # (GS,GS)
        s = s + amask_ref[...]

        # 4) ONE softmax pass for all heads, entirely in f32 (v5e has no bf16
        #    VPU/EUP path); approximate reciprocal runs on the EUP slot.
        s = s - jnp.max(s, axis=-1, keepdims=True)
        p = jnp.exp(s)
        p = p * pl.reciprocal(jnp.sum(p, axis=-1, keepdims=True), approx=True)

        # 5) Attention-weighted values: ONE MXU call (bf16 in, f32 acc).  Each
        #    head's context lands in its own disjoint lane block, so heads are
        #    merged back with nh-1 adds over aligned sublane slices.
        ctx = jnp.dot(p.astype(jnp.bfloat16), v.astype(jnp.bfloat16),
                      preferred_element_type=jnp.float32)                    # (GS,H)
        ctx2 = ctx[0:BS]
        for h in range(1, nh):
            ctx2 = ctx2 + ctx[h * BS:(h + 1) * BS]                           # (BS,H)

        # 6) Output projection: ONE (BS,H)@(H,H) matmul + bias, one dense
        #    full-block store (no per-batch store loop).
        y = jnp.dot(ctx2.astype(jnp.bfloat16), woT_ref[...],
                    preferred_element_type=jnp.float32) + bo_ref[...]
        o_ref[...] = y.astype(o_ref.dtype)

    return kernel


def self_attention_pallas(x, in_proj_weight, in_proj_bias,
                          out_proj_weight, out_proj_bias):
    """Batch-first multi-head self-attention; x: (B, S, H) -> (B, S, H)."""
    B, S, H = x.shape
    nh, d = NUM_HEADS, HEAD_DIM
    BS = B * S
    GS = nh * BS
    scale = 1.0 / math.sqrt(d)

    # Everything fits in ONE grid step on every TPU generation (per review:
    # at ~2 KiB of work, a second grid step's ~0.35 us overhead exceeds any
    # megacore benefit; no device-kind sniffing).  If B or S ever grow, cap GS
    # (score buffer is GS^2 f32; v7x has only 64 MiB physical VMEM) and push
    # the remainder onto a "parallel" grid axis instead of growing this block.

    # ---- host-side parameter / mask prep (plain JAX, outside the kernel) ----
    wqkvT = jnp.concatenate(
        [in_proj_weight[:H].T * scale, in_proj_weight[H:].T], axis=1)          # (H,3H)
    bqkv = jnp.concatenate(
        [in_proj_bias[:H] * scale, in_proj_bias[H:]]).reshape(1, 3 * H)         # (1,3H)
    woT = out_proj_weight.T.astype(jnp.bfloat16)                                # (H,H)
    bo = out_proj_bias.reshape(1, H).astype(jnp.float32)                        # (1,H)

    # Replicated-row i corresponds to head i//BS and original (batch,seq) row i%BS.
    row = jnp.arange(GS)
    row_head = row // BS
    row_batch = (row % BS) // S
    col = jnp.arange(3 * H)
    col_head = jnp.where(col < H, -1, (col % H) // d)       # q columns: always keep
    selmask = ((col_head[None, :] < 0) |
               (col_head[None, :] == row_head[:, None])).astype(jnp.float32)   # (GS,3H)
    valid = ((row_head[:, None] == row_head[None, :]) &
             (row_batch[:, None] == row_batch[None, :]))
    amask = jnp.where(valid, 0.0, -1e30).astype(jnp.float32)                   # (GS,GS)

    x2d = x.reshape(BS, H)
    kernel = _make_kernel(B, S, H, nh, d)

    out2d = pl.pallas_call(
        kernel,
        out_shape=jax.ShapeDtypeStruct((BS, H), x.dtype),
        grid=(1,),
        in_specs=[
            pl.BlockSpec((BS, H), lambda i: (0, 0)),          # activations
            pl.BlockSpec((H, 3 * H), lambda i: (0, 0)),       # fused Wqkv^T
            pl.BlockSpec((1, 3 * H), lambda i: (0, 0)),       # fused bias
            pl.BlockSpec((GS, 3 * H), lambda i: (0, 0)),      # head selector
            pl.BlockSpec((GS, GS), lambda i: (0, 0)),         # additive mask
            pl.BlockSpec((H, H), lambda i: (0, 0)),           # out_proj W^T
            pl.BlockSpec((1, H), lambda i: (0, 0)),           # out_proj bias
        ],
        out_specs=pl.BlockSpec((BS, H), lambda i: (0, 0)),
        compiler_params=pltpu.CompilerParams(
            dimension_semantics=("arbitrary",)),
    )(x2d, wqkvT, bqkv, selmask, amask, woT, bo)
    return out2d.reshape(B, S, H)


def self_attention_reference(x, in_proj_weight, in_proj_bias,
                             out_proj_weight, out_proj_bias):
    """Pure-JAX reference matching torch.nn.MultiheadAttention forward."""
    B, S, H = x.shape
    nh, d = NUM_HEADS, HEAD_DIM
    hp = lax.Precision.HIGHEST
    qkv = jnp.einsum('bsh,oh->bso', x, in_proj_weight, precision=hp) + in_proj_bias
    q, k, v = qkv[..., :H], qkv[..., H:2 * H], qkv[..., 2 * H:]

    def heads(t):  # (B,S,H) -> (B,nh,S,d)
        return jnp.transpose(t.reshape(B, S, nh, d), (0, 2, 1, 3))

    qh, kh, vh = heads(q), heads(k), heads(v)
    s = jnp.einsum('bhqd,bhkd->bhqk', qh, kh, precision=hp) / math.sqrt(d)
    p = jax.nn.softmax(s, axis=-1)
    ctx = jnp.einsum('bhqk,bhkd->bhqd', p, vh, precision=hp)
    ctx = jnp.transpose(ctx, (0, 2, 1, 3)).reshape(B, S, H)
    return jnp.einsum('bsh,oh->bso', ctx, out_proj_weight, precision=hp) + out_proj_bias


if __name__ == "__main__":
    key = jax.random.PRNGKey(0)
    kx, k1, k2, k3, k4 = jax.random.split(key, 5)

    # Deterministic synthetic parameters (shapes match nn.MultiheadAttention).
    x = jax.random.normal(kx, (BATCH, SEQ, HIDDEN), dtype=jnp.float32)
    in_proj_weight = jax.random.normal(k1, (3 * HIDDEN, HIDDEN), jnp.float32) * 0.1
    in_proj_bias = jax.random.normal(k2, (3 * HIDDEN,), jnp.float32) * 0.1
    out_proj_weight = jax.random.normal(k3, (HIDDEN, HIDDEN), jnp.float32) * 0.1
    out_proj_bias = jax.random.normal(k4, (HIDDEN,), jnp.float32) * 0.1

    out = self_attention_pallas(x, in_proj_weight, in_proj_bias,
                                out_proj_weight, out_proj_bias)
    out = jax.block_until_ready(out)

    ref = self_attention_reference(x, in_proj_weight, in_proj_bias,
                                   out_proj_weight, out_proj_bias)
    assert out.shape == (BATCH, SEQ, HIDDEN)
    # Tolerance 1e-2: the score / context / out-projection matmuls use bf16
    # operands (f32 accumulation) per the perf review, and the softmax
    # normalization uses the EUP approximate reciprocal; the f32 reference is
    # exact, so the comparison absorbs the bf16 operand rounding (~1e-3 rms).
    assert jnp.allclose(out, ref, atol=1e-2, rtol=1e-2), "mismatch vs JAX reference"
    print("KERNEL_OK")
</pallas_src>

<mosaic_0001>
module attributes {stable_mosaic.version = 11 : i64} {
  func.func @kernel(%arg0: i32, %arg1: memref<16x32xf32, #tpu.memory_space<vmem>>, %arg2: memref<32x96xf32, #tpu.memory_space<vmem>>, %arg3: memref<1x96xf32, #tpu.memory_space<vmem>>, %arg4: memref<64x96xf32, #tpu.memory_space<vmem>>, %arg5: memref<64x64xf32, #tpu.memory_space<vmem>>, %arg6: memref<32x32xbf16, #tpu.memory_space<vmem>>, %arg7: memref<1x32xf32, #tpu.memory_space<vmem>>, %arg8: memref<16x32xf32, #tpu.memory_space<vmem>>) attributes {dimension_semantics = [#tpu.dimension_semantics<arbitrary>], iteration_bounds = array<i64: 1>, scalar_prefetch = 0 : i64, scratch_operands = 0 : i64, tpu.core_type = #tpu.core_type<tc>, window_params = [{pipeline_mode = #tpu.pipeline_mode<synchronous>, transform_indices = @transform_0, window_bounds = array<i64: 16, 32>}, {pipeline_mode = #tpu.pipeline_mode<synchronous>, transform_indices = @transform_1, window_bounds = array<i64: 32, 96>}, {pipeline_mode = #tpu.pipeline_mode<synchronous>, transform_indices = @transform_2, window_bounds = array<i64: 1, 96>}, {pipeline_mode = #tpu.pipeline_mode<synchronous>, transform_indices = @transform_3, window_bounds = array<i64: 64, 96>}, {pipeline_mode = #tpu.pipeline_mode<synchronous>, transform_indices = @transform_4, window_bounds = array<i64: 64, 64>}, {pipeline_mode = #tpu.pipeline_mode<synchronous>, transform_indices = @transform_5, window_bounds = array<i64: 32, 32>}, {pipeline_mode = #tpu.pipeline_mode<synchronous>, transform_indices = @transform_6, window_bounds = array<i64: 1, 32>}, {pipeline_mode = #tpu.pipeline_mode<synchronous>, transform_indices = @transform_7, window_bounds = array<i64: 16, 32>}]} {
    %c0 = arith.constant 0 : index
    %c0_0 = arith.constant 0 : index
    %0 = vector.load %arg1[%c0, %c0_0] : memref<16x32xf32, #tpu.memory_space<vmem>>, vector<16x32xf32>
    %c0_1 = arith.constant 0 : index
    %c0_2 = arith.constant 0 : index
    %1 = vector.load %arg2[%c0_1, %c0_2] : memref<32x96xf32, #tpu.memory_space<vmem>>, vector<32x96xf32>
    %cst = arith.constant dense<0.000000e+00> : vector<16x96xf32>
    %2 = tpu.matmul %0, %1, %cst {dimension_numbers = #tpu.dot_dimension_numbers<[1], [0], [0], [1], [0, 0, 1, 1], [], []>} : vector<16x32xf32>, vector<32x96xf32>, vector<16x96xf32> -> vector<16x96xf32>
    %c0_3 = arith.constant 0 : index
    %c0_4 = arith.constant 0 : index
    %3 = vector.load %arg3[%c0_3, %c0_4] : memref<1x96xf32, #tpu.memory_space<vmem>>, vector<1x96xf32>
    %4 = vector.broadcast %3 : vector<1x96xf32> to vector<16x96xf32>
    %5 = arith.addf %2, %4 : vector<16x96xf32>
    %6 = tpu.concatenate %5, %5, %5, %5 in 0 : vector<16x96xf32>, vector<16x96xf32>, vector<16x96xf32>, vector<16x96xf32> -> vector<64x96xf32>
    %c0_5 = arith.constant 0 : index
    %c0_6 = arith.constant 0 : index
    %7 = vector.load %arg4[%c0_5, %c0_6] : memref<64x96xf32, #tpu.memory_space<vmem>>, vector<64x96xf32>
    %8 = arith.mulf %6, %7 : vector<64x96xf32>
    %9 = vector.extract_strided_slice %8 {offsets = [0, 0], sizes = [64, 32], strides = [1, 1]} : vector<64x96xf32> to vector<64x32xf32>
    %10 = vector.extract_strided_slice %8 {offsets = [0, 32], sizes = [64, 32], strides = [1, 1]} : vector<64x96xf32> to vector<64x32xf32>
    %11 = vector.extract_strided_slice %8 {offsets = [0, 64], sizes = [64, 32], strides = [1, 1]} : vector<64x96xf32> to vector<64x32xf32>
    %12 = arith.truncf %9 : vector<64x32xf32> to vector<64x32xbf16>
    %13 = arith.truncf %10 : vector<64x32xf32> to vector<64x32xbf16>
    %cst_7 = arith.constant dense<0.000000e+00> : vector<64x64xf32>
    %14 = tpu.matmul %12, %13, %cst_7 {dimension_numbers = #tpu.dot_dimension_numbers<[1], [1], [0], [0], [0, 0, 1, 0], [], []>} : vector<64x32xbf16>, vector<64x32xbf16>, vector<64x64xf32> -> vector<64x64xf32>
    %c0_8 = arith.constant 0 : index
    %c0_9 = arith.constant 0 : index
    %15 = vector.load %arg5[%c0_8, %c0_9] : memref<64x64xf32, #tpu.memory_space<vmem>>, vector<64x64xf32>
    %16 = arith.addf %14, %15 : vector<64x64xf32>
    %cst_10 = arith.constant dense<0xFF800000> : vector<64xf32>
    %17 = vector.multi_reduction <maximumf>, %16, %cst_10 [1] : vector<64x64xf32> to vector<64xf32>
    %18 = vector.shape_cast %17 : vector<64xf32> to vector<64x1xf32>
    %19 = vector.broadcast %18 : vector<64x1xf32> to vector<64x64xf32>
    %20 = arith.subf %16, %19 : vector<64x64xf32>
    %21 = math.exp %20 : vector<64x64xf32>
    %cst_11 = arith.constant dense<0.000000e+00> : vector<64xf32>
    %22 = vector.multi_reduction <add>, %21, %cst_11 [1] : vector<64x64xf32> to vector<64xf32>
    %23 = vector.shape_cast %22 : vector<64xf32> to vector<64x1xf32>
    %24 = tpu.reciprocal %23 {approx = true} : vector<64x1xf32> -> vector<64x1xf32>
    %25 = vector.broadcast %24 : vector<64x1xf32> to vector<64x64xf32>
    %26 = arith.mulf %21, %25 : vector<64x64xf32>
    %27 = arith.truncf %26 : vector<64x64xf32> to vector<64x64xbf16>
    %28 = arith.truncf %11 : vector<64x32xf32> to vector<64x32xbf16>
    %cst_12 = arith.constant dense<0.000000e+00> : vector<64x32xf32>
    %29 = tpu.matmul %27, %28, %cst_12 {dimension_numbers = #tpu.dot_dimension_numbers<[1], [0], [0], [1], [0, 0, 1, 1], [], []>} : vector<64x64xbf16>, vector<64x32xbf16>, vector<64x32xf32> -> vector<64x32xf32>
    %30 = vector.extract_strided_slice %29 {offsets = [0, 0], sizes = [16, 32], strides = [1, 1]} : vector<64x32xf32> to vector<16x32xf32>
    %31 = vector.extract_strided_slice %29 {offsets = [16, 0], sizes = [16, 32], strides = [1, 1]} : vector<64x32xf32> to vector<16x32xf32>
    %32 = arith.addf %30, %31 : vector<16x32xf32>
    %33 = vector.extract_strided_slice %29 {offsets = [32, 0], sizes = [16, 32], strides = [1, 1]} : vector<64x32xf32> to vector<16x32xf32>
    %34 = arith.addf %32, %33 : vector<16x32xf32>
    %35 = vector.extract_strided_slice %29 {offsets = [48, 0], sizes = [16, 32], strides = [1, 1]} : vector<64x32xf32> to vector<16x32xf32>
    %36 = arith.addf %34, %35 : vector<16x32xf32>
    %37 = arith.truncf %36 : vector<16x32xf32> to vector<16x32xbf16>
    %c0_13 = arith.constant 0 : index
    %c0_14 = arith.constant 0 : index
    %38 = vector.load %arg6[%c0_13, %c0_14] : memref<32x32xbf16, #tpu.memory_space<vmem>>, vector<32x32xbf16>
    %cst_15 = arith.constant dense<0.000000e+00> : vector<16x32xf32>
    %39 = tpu.matmul %37, %38, %cst_15 {dimension_numbers = #tpu.dot_dimension_numbers<[1], [0], [0], [1], [0, 0, 1, 1], [], []>} : vector<16x32xbf16>, vector<32x32xbf16>, vector<16x32xf32> -> vector<16x32xf32>
    %c0_16 = arith.constant 0 : index
    %c0_17 = arith.constant 0 : index
    %40 = vector.load %arg7[%c0_16, %c0_17] : memref<1x32xf32, #tpu.memory_space<vmem>>, vector<1x32xf32>
    %41 = vector.broadcast %40 : vector<1x32xf32> to vector<16x32xf32>
    %42 = arith.addf %39, %41 : vector<16x32xf32>
    %c0_18 = arith.constant 0 : index
    %c0_19 = arith.constant 0 : index
    %43 = vector.load %arg8[%c0_18, %c0_19] : memref<16x32xf32, #tpu.memory_space<vmem>>, vector<16x32xf32>
    tpu.vector_store %arg8[%c0_18, %c0_19], %42 {strides = array<i32>} : memref<16x32xf32, #tpu.memory_space<vmem>>, vector<16x32xf32>,
    return
  }
  func.func @transform_0(%arg0: i32) -> (i32, i32) {
    %c0_i32 = arith.constant 0 : i32
    %c0_i32_0 = arith.constant 0 : i32
    %c0_i32_1 = arith.constant 0 : i32
    return %c0_i32, %c0_i32_0 : i32, i32
  }
  func.func @transform_1(%arg0: i32) -> (i32, i32) {
    %c0_i32 = arith.constant 0 : i32
    %c0_i32_0 = arith.constant 0 : i32
    %c0_i32_1 = arith.constant 0 : i32
    return %c0_i32, %c0_i32_0 : i32, i32
  }
  func.func @transform_2(%arg0: i32) -> (i32, i32) {
    %c0_i32 = arith.constant 0 : i32
    %c0_i32_0 = arith.constant 0 : i32
    %c0_i32_1 = arith.constant 0 : i32
    return %c0_i32, %c0_i32_0 : i32, i32
  }
  func.func @transform_3(%arg0: i32) -> (i32, i32) {
    %c0_i32 = arith.constant 0 : i32
    %c0_i32_0 = arith.constant 0 : i32
    %c0_i32_1 = arith.constant 0 : i32
    return %c0_i32, %c0_i32_0 : i32, i32
  }
  func.func @transform_4(%arg0: i32) -> (i32, i32) {
    %c0_i32 = arith.constant 0 : i32
    %c0_i32_0 = arith.constant 0 : i32
    %c0_i32_1 = arith.constant 0 : i32
    return %c0_i32, %c0_i32_0 : i32, i32
  }
  func.func @transform_5(%arg0: i32) -> (i32, i32) {
    %c0_i32 = arith.constant 0 : i32
    %c0_i32_0 = arith.constant 0 : i32
    %c0_i32_1 = arith.constant 0 : i32
    return %c0_i32, %c0_i32_0 : i32, i32
  }
  func.func @transform_6(%arg0: i32) -> (i32, i32) {
    %c0_i32 = arith.constant 0 : i32
    %c0_i32_0 = arith.constant 0 : i32
    %c0_i32_1 = arith.constant 0 : i32
    return %c0_i32, %c0_i32_0 : i32, i32
  }
  func.func @transform_7(%arg0: i32) -> (i32, i32) {
    %c0_i32 = arith.constant 0 : i32
    %c0_i32_0 = arith.constant 0 : i32
    %c0_i32_1 = arith.constant 0 : i32
    return %c0_i32, %c0_i32_0 : i32, i32
  }
}

</mosaic_0001>

<bundles_post_ra>
// kernel: tpu_custom_call.1
= control target key start
LH: loop header
LB: loop body
LE: loop exit
PB: predicated region body
PF: predicated region fallthrough
CT: control target
= control target key end

     0   :  { %12 = vsyncpa [#allocation3], 0  ;;  %s1071_s0 = inlined_call_operand.hbm [shape: f32[16,32], index: 0, kind: input, shape index: {}]   ;;  %s1072_s1 = inlined_call_operand.hbm [shape: f32[32,96], index: 1, kind: input, shape index: {}]   ;;  %s1073_s2 = inlined_call_operand.vmem [shape: f32[1,96], index: 2, kind: input, shape index: {}]   ;;  %s1074_s3 = inlined_call_operand.hbm [shape: f32[64,96], index: 3, kind: input, shape index: {}]   ;;  %s1075_s4 = inlined_call_operand.hbm [shape: f32[64,64], index: 4, kind: input, shape index: {}]   ;;  %s1076_s5 = inlined_call_operand.vmem [shape: bf16[32,32], index: 5, kind: input, shape index: {}]   ;;  %s1077_s6 = inlined_call_operand.vmem [shape: f32[1,32], index: 6, kind: input, shape index: {}]   ;;  %s1078_s7 = inlined_call_operand.hbm [shape: f32[16,32], index: 7, kind: output, shape index: {}]  }
   0x1   :  { %13 = vsyncpa [#allocation6], 0 }
   0x2   :  { %14 = vsyncpa [#allocation9], 0 }
   0x3   :  { %15 = vsyncpa [#allocation4], 0  ;;  %s850_s24 = smov [#allocation5]   ;;  %s851_s26 = smov [#allocation2]  }
   0x4   :  { %s33_s25 = sshll.u32 %s850_s24, 4  ;;  %s21_s27 = sshll.u32 %s851_s26, 4  ;;  %s34_s25 = int_to_ptr.vmem [resolvable:$true] %s33_s25  ;;  %s901_s27 = int_to_ptr.vmem [resolvable:$true] %s21_s27 }
   0x5   :  { %s732_s30 = scalar_lea.hbm %s1072_s1, 512 }
   0x6   :  { %p733_p0 = scmp.ne.s32.totalorder %s1072_s1, %s732_s30  ;;  %p736_p1 = scmp.lt.u32.totalorder %s732_s30, %s1072_s1 }
   0x8   :  { %p738_p2 = pnand %p736_p1, %p733_p0 }
   0xa   :  { %741 = shalt.err (!%p738_p2)
}
   0xb   :  { %s742_s12 = scalar_lea.vmem %s34_s25, 512  ;;  %p747_p4 = scmp.lt.s32.totalorder %s34_s25, %s34_s25 }
   0xc   :  { %p743_p3 = scmp.ne.s32.totalorder %s34_s25, %s742_s12  ;;  %p748_p5 = scmp.lt.s32.totalorder %s742_s12, %s742_s12 }
   0xe   :  { %p749_p6 = por %p748_p5, %p747_p4 }
  0x10   :  { %p750_p7 = pnand %p749_p6, %p743_p3 }
  0x12   :  { %753 = shalt.err (!%p750_p7)
}
  0x13   :  { %s852_s13 = smov 128   ;;  %s853_s14 = smov 8  }
  0x14   :  { %39 = dma.hbm_to_vmem [thread:$0]  %s1072_s1, 512, %s34_s25, [#allocation6], %s852_s13, %s852_s13, %s853_s14  }
  0x15   :  { %s754_s19 = scalar_lea.hbm %s1071_s0, 256 }
  0x16   :  { %p755_p8 = scmp.ne.s32.totalorder %s1071_s0, %s754_s19  ;;  %p758_p9 = scmp.lt.u32.totalorder %s754_s19, %s1071_s0 }
  0x18   :  { %p760_p10 = pnand %p758_p9, %p755_p8 }
  0x1a   :  { %763 = shalt.err (!%p760_p10)
}
  0x1b   :  { %s764_s24 = scalar_lea.vmem %s901_s27, 256  ;;  %p769_p12 = scmp.lt.s32.totalorder %s901_s27, %s901_s27 }
  0x1c   :  { %p765_p11 = scmp.ne.s32.totalorder %s901_s27, %s764_s24  ;;  %p770_p13 = scmp.lt.s32.totalorder %s764_s24, %s764_s24 }
  0x1e   :  { %p771_p0 = por %p770_p13, %p769_p12 }
  0x20   :  { %p772_p1 = pnand %p771_p0, %p765_p11 }
  0x22   :  { %775 = shalt.err (!%p772_p1)
}
  0x23   :  { %27 = dma.hbm_to_vmem [thread:$0]  %s1071_s0, 256, %s901_s27, [#allocation3], %s852_s13, %s852_s13, %s853_s14  }
  0x24   :  { %s854_s26 = smov [#allocation7]   ;;  %s855_s29 = smov [#allocation8]  }
  0x25   :  { %s47_s28 = sshll.u32 %s854_s26, 4  ;;  %s59_s30 = sshll.u32 %s855_s29, 4  ;;  %s48_s28 = int_to_ptr.vmem [resolvable:$true] %s47_s28  ;;  %s938_s30 = int_to_ptr.vmem [resolvable:$true] %s59_s30 }
  0x26   :  { %s776_s10 = scalar_lea.hbm %s1074_s3, 1024 }
  0x27   :  { %p777_p2 = scmp.ne.s32.totalorder %s1074_s3, %s776_s10  ;;  %p780_p3 = scmp.lt.u32.totalorder %s776_s10, %s1074_s3 }
  0x29   :  { %p782_p4 = pnand %p780_p3, %p777_p2 }
  0x2b   :  { %785 = shalt.err (!%p782_p4)
}
  0x2c   :  { %s786_s0 = scalar_lea.vmem %s48_s28, 1024  ;;  %p791_p6 = scmp.lt.s32.totalorder %s48_s28, %s48_s28 }
  0x2d   :  { %p787_p5 = scmp.ne.s32.totalorder %s48_s28, %s786_s0  ;;  %p792_p7 = scmp.lt.s32.totalorder %s786_s0, %s786_s0 }
  0x2f   :  { %p793_p8 = por %p792_p7, %p791_p6 }
  0x31   :  { %p794_p9 = pnand %p793_p8, %p787_p5 }
  0x33   :  { %797 = shalt.err (!%p794_p9)
}
  0x34   :  { %53 = dma.hbm_to_vmem [thread:$0]  %s1074_s3, 1024, %s48_s28, [#allocation6], %s852_s13, %s852_s13, %s853_s14  }
  0x35   :  { %s798_s20 = scalar_lea.hbm %s1075_s4, 1024 }
  0x36   :  { %p799_p10 = scmp.ne.s32.totalorder %s1075_s4, %s798_s20  ;;  %p802_p11 = scmp.lt.u32.totalorder %s798_s20, %s1075_s4 }
  0x38   :  { %p804_p12 = pnand %p802_p11, %p799_p10 }
  0x3a   :  { %807 = shalt.err (!%p804_p12)
}
  0x3b   :  { %s808_s1 = scalar_lea.vmem %s938_s30, 1024  ;;  %p813_p0 = scmp.lt.s32.totalorder %s938_s30, %s938_s30 }
  0x3c   :  { %p809_p13 = scmp.ne.s32.totalorder %s938_s30, %s808_s1  ;;  %p814_p1 = scmp.lt.s32.totalorder %s808_s1, %s808_s1 }
  0x3e   :  { %p815_p2 = por %p814_p1, %p813_p0 }
  0x40   :  { %p816_p3 = pnand %p815_p2, %p809_p13 }
  0x42   :  { %819 = shalt.err (!%p816_p3)
}
  0x43   :  { %65 = dma.hbm_to_vmem [thread:$0]  %s1075_s4, 1024, %s938_s30, [#allocation9], %s852_s13, %s852_s13, %s853_s14  }
  0x44   :  { %842 = dma.done.wait [#allocation3], 256  }
  0x45   :  { %843 = vsyncadd [#allocation3], 4294967040 }
  0x46   :  { %844 = dma.done.wait [#allocation6], 1536  }
  0x47   :  { %845 = vsyncadd [#allocation6], 4294965760 }
  0x48   :  { %846 = dma.done.wait [#allocation9], 1024  }
  0x49   :  { %847 = vsyncadd [#allocation9], 4294966272  ;;  %vm96_vm0 = vcmask 261120   ;;  %v85_v0 = vld [vmem:[#allocation5] sm:$0xff]  ;;  %v86_v1 = vld [vmem:[#allocation5 + $0x8] sm:$0xff]  ;;  %vm307_vm1 = vcmask 523264  }
  0x4a   :  { %v87_v2 = vld [vmem:[#allocation5 + $0x10] sm:$0xff]  ;;  %v675_v3 = vpack.c.bf16 %v86_v1, %v85_v0  ;;  %v88_v4 = vld [vmem:[#allocation5 + $0x18] sm:$0xff]  ;;  %v182_v9 = vld [vmem:[#allocation7 + $0x20] sm:$0xff]  ;;  %s857_s28 = smov 64   ;;  %vm859_vm2 = vmmov 0   ;;  %s860_s11 = smov [#allocation10]  }
  0x4b   :  { %v83_v5 = vld [vmem:[#allocation2] sm:$0xff]  ;;  %v679_v6 = vpack.c.bf16 %v88_v4, %v87_v2  ;;  %v84_v7 = vld [vmem:[#allocation2 + $0x8] sm:$0xff]  ;;  %v183_v10 = vld [vmem:[#allocation7 + $0x28] sm:$0xff]  ;;  %s570_s12 = sshll.u32 %s860_s11, 4  ;;  %s571_s12 = int_to_ptr.vmem [resolvable:$true] %s570_s12 }
  0x4c   :  { %632 = vmatprep.mubr.msk.f32.mxu0 %vm96_vm0, %v83_v5  ;;  %676 = vmatprep.subr.bf16.mxu0 %v675_v3  ;;  %v584_v8 = vld [vmem:[%s1073_s2] ss:$0 sm:$0xff]  ;;  %v179_v12 = vld [vmem:[#allocation7 + $0x8] sm:$0xff]  ;;  %v185_v13 = vld [vmem:[#allocation7 + $0x38] sm:$0xff]  ;;  %s856_s2 = smov 96   ;;  %s820_s15 = scalar_lea.vmem %s571_s12, 256 }
  0x4d   :  { %678 = vmatpush3.bf16.msra.mxu0 %v675_v3  ;;  %v181_v14 = vld [vmem:[#allocation7 + $0x18] sm:$0xff]  ;;  %v178_v17 = vld [vmem:[#allocation7] sm:$0xff]  ;;  %v184_v18 = vld [vmem:[#allocation7 + $0x30] sm:$0xff]  ;;  %p821_p4 = scmp.ne.s32.totalorder %s571_s12, %s820_s15  ;;  %p825_p5 = scmp.lt.s32.totalorder %s571_s12, %s571_s12 }
  0x4e   :  { %680 = vmatprep.subr.bf16.mxu0 %v679_v6  ;;  %v180_v19 = vld [vmem:[#allocation7 + $0x10] sm:$0xff]  ;;  %v198_v41 = vld [vmem:[#allocation8] sm:$0xff]  ;;  %v199_v45 = vld [vmem:[#allocation8 + $0x8] sm:$0xff]  ;;  %p826_p6 = scmp.lt.s32.totalorder %s820_s15, %s820_s15 }
  0x4f   :  { %v200_v43 = vld [vmem:[#allocation8 + $0x10] sm:$0xff]  ;;  %v201_v52 = vld [vmem:[#allocation8 + $0x18] sm:$0xff]  ;;  %v202_v54 = vld [vmem:[#allocation8 + $0x20] sm:$0xff] }
  0x50   :  { %v204_v58 = vld [vmem:[#allocation8 + $0x30] sm:$0xff]  ;;  %v203_v60 = vld [vmem:[#allocation8 + $0x28] sm:$0xff]  ;;  %v205_v4 = vld [vmem:[#allocation8 + $0x38] sm:$0xff]  ;;  %p827_p7 = por %p826_p6, %p825_p5 }
  0x51   :  { %682 = vmatpush3.bf16.msra.mxu0 %v679_v6 }
  0x52   :  { %p828_p8 = pnand %p827_p7, %p821_p4 }
  0x54   :  { %633 = vmatmul.mubr.msk.f32.vlgmr.msra.gmra.mrb[0].mxu0 %vm96_vm0, %v84_v7 }
 0x127   :  { %v634_v11 = vpop.f32.mrb[0].mxu0 }
 0x128   :  { %v175_v15 = vadd.f32 %v634_v11, %v584_v8  ;;  %v169_v16 = vpop.f32.mrb[1].mxu0 }
 0x129   :  { %v170_v20 = vadd.f32 %v584_v8, %v169_v16 }
 0x12a   :  { %v191_v21 = vmul.f32 %v183_v10, %v175_v15  ;;  %v187_v22 = vmul.f32 %v179_v12, %v175_v15  ;;  %v193_v23 = vmul.f32 %v185_v13, %v175_v15  ;;  %v189_v24 = vmul.f32 %v181_v14, %v175_v15 }
 0x12b   :  { %v190_v25 = vmul.f32 %v182_v9, %v170_v20  ;;  %v186_v26 = vmul.f32 %v178_v17, %v170_v20  ;;  %v192_v27 = vmul.f32 %v184_v18, %v170_v20  ;;  %v188_v28 = vmul.f32 %v180_v19, %v170_v20 }
 0x12d   :  { %v980_v29 = vpack.c.bf16 %v191_v21, %v190_v25  ;;  %v982_v30 = vpack.c.bf16 %v187_v22, %v186_v26  ;;  %v984_v31 = vpack.c.bf16 %v193_v23, %v192_v27  ;;  %v986_v32 = vpack.c.bf16 %v189_v24, %v188_v28 }
 0x12f   :  { %214 = vrot.lane.b32.xlu1 %v980_v29, %s856_s2  ;;  %210 = vrot.lane.b32.xlu0 %v982_v30, %s856_s2 }
 0x130   :  { %643 = vmatprep.mubr.msk.bf16.mxu1 %vm96_vm0, %v982_v30 }
 0x133   :  { %216 = vrot.lane.b32.xlu1 %v984_v31, %s856_s2  ;;  %212 = vrot.lane.b32.xlu0 %v986_v32, %s856_s2 }
 0x1a1   :  { %v211_v33 = vpop.permute.xlu0 %210  ;;  %v215_v37 = vpop.permute.xlu1 %214 }
 0x1a2   :  { %683 = vmatprep.subr.msk.bf16.mxu1 %vm96_vm0, %v211_v33  ;;  %v231_v34 = vsel %vm96_vm0, %v211_v33, 0  ;;  %v237_v38 = vsel %vm96_vm0, %v215_v37, 0 }
 0x1a3   :  { %636 = vmatpush3.bf16.xpose.msra.mxu1 %v231_v34 }
 0x1a5   :  { %v213_v35 = vpop.permute.xlu0 %212  ;;  %v217_v39 = vpop.permute.xlu1 %216 }
 0x1a6   :  { %684 = vmatprep.subr.msk.bf16.mxu1 %vm96_vm0, %v213_v35  ;;  %v234_v36 = vsel %vm96_vm0, %v213_v35, 0  ;;  %v240_v40 = vsel %vm96_vm0, %v217_v39, 0 }
 0x1ab   :  { %638 = vmatpush3.bf16.xpose.msra.mxu1 %v234_v36 }
 0x1ac   :  { %685 = vmatprep.subr.msk.bf16.mxu1 %vm96_vm0, %v215_v37 }
 0x1b3   :  { %640 = vmatpush3.bf16.xpose.msra.mxu1 %v237_v38 }
 0x1b4   :  { %686 = vmatprep.subr.msk.bf16.mxu1 %vm96_vm0, %v217_v39 }
 0x1bb   :  { %642 = vmatpush3.bf16.xpose.msra.mxu1 %v240_v40 }
 0x1c2   :  { %644 = vmatmul.mubr.msk.bf16.vlgmr.msra.gmra.mrb[0].mxu1 %vm96_vm0, %v986_v32 }
 0x1c3   :  { %647 = vmatprep.mubr.msk.bf16.mxu1 %vm96_vm0, %v980_v29 }
 0x1ca   :  { %648 = vmatmul.mubr.msk.bf16.gmra.mrb[4].mxu1 %vm96_vm0, %v984_v31 }
 0x295   :  { %v645_v42 = vpop.f32.mrb[0].mxu1 }
 0x296   :  { %v276_v44 = vpop.f32.mrb[1].mxu1  ;;  %v285_v49 = vadd.f32 %v645_v42, %v200_v43 }
 0x297   :  { %v277_v46 = vadd.f32 %v276_v44, %v198_v41  ;;  %v646_v47 = vpop.f32.mrb[2].mxu1 }
 0x298   :  { %v279_v48 = vpop.f32.mrb[3].mxu1  ;;  %v288_v55 = vadd.f32 %v646_v47, %v201_v52  ;;  %v314_v57 = vsel %vm307_vm1, %v285_v49, -inf }
 0x299   :  { %v280_v50 = vadd.f32 %v279_v48, %v199_v45  ;;  %v308_v51 = vsel %vm307_vm1, %v277_v46, -inf }
 0x29a   :  { %309 = vmax.xlane.f32.xlu0 %v308_v51  ;;  %v317_v3 = vsel %vm307_vm1, %v288_v55, -inf }
 0x29b   :  { %v311_v53 = vsel %vm307_vm1, %v280_v50, -inf }
 0x29c   :  { %312 = vmax.xlane.f32.xlu1 %v311_v53 }
 0x29d   :  { %v649_v56 = vpop.f32.mrb[4].mxu1 }
 0x29e   :  { %v292_v59 = vpop.f32.mrb[5].mxu1  ;;  %315 = vmax.xlane.f32.xlu0 %v314_v57  ;;  %v301_v0 = vadd.f32 %v649_v56, %v204_v58 }
 0x29f   :  { %v293_v61 = vadd.f32 %v292_v59, %v202_v54  ;;  %v650_v62 = vpop.f32.mrb[6].mxu1 }
 0x2a0   :  { %v295_v63 = vpop.f32.mrb[7].mxu1  ;;  %v304_v5 = vadd.f32 %v650_v62, %v205_v4  ;;  %v326_v6 = vsel %vm307_vm1, %v301_v0, -inf }
 0x2a1   :  { %v296_v1 = vadd.f32 %v295_v63, %v203_v60  ;;  %v320_v2 = vsel %vm307_vm1, %v293_v61, -inf }
 0x2a2   :  { %321 = vmax.xlane.f32.xlu1 %v320_v2  ;;  %318 = vmax.xlane.f32.xlu0 %v317_v3  ;;  %v329_v8 = vsel %vm307_vm1, %v304_v5, -inf }
 0x2a3   :  { %v323_v7 = vsel %vm307_vm1, %v296_v1, -inf }
 0x2a6   :  { %327 = vmax.xlane.f32.xlu1 %v326_v6  ;;  %324 = vmax.xlane.f32.xlu0 %v323_v7 }
 0x2aa   :  { %330 = vmax.xlane.f32.xlu0 %v329_v8 }
 0x2b7   :  { %400 = vrot.lane.b32.xlu1 %v982_v30, %s857_s28 }
 0x327   :  { %v310_v9 = vpop.xlane.xlu0 %309 }
 0x328   :  { %v332_v10 = vsub.f32 %v277_v46, %v310_v9 }
 0x329   :  { %v313_v11 = vpop.xlane.xlu1 %312 }
 0x32a   :  { %v340_v14 = vmul.f32 1.442695, %v332_v10  ;;  %v333_v16 = vsub.f32 %v280_v50, %v313_v11 }
 0x32b   :  { %v316_v12 = vpop.xlane.xlu0 %315 }
 0x32c   :  { %v334_v13 = vsub.f32 %v285_v49, %v316_v12  ;;  %v342_v22 = vmul.f32 1.442695, %v333_v16 }
 0x32e   :  { %v344_v15 = vmul.f32 1.442695, %v334_v13 }
 0x32f   :  { %v322_v17 = vpop.xlane.xlu1 %321  ;;  %v319_v18 = vpop.xlane.xlu0 %318 }
 0x330   :  { %700 = vpow2.f32 %v344_v15  ;;  %v335_v19 = vsub.f32 %v288_v55, %v319_v18  ;;  %v336_v20 = vsub.f32 %v293_v61, %v322_v17  ;;  %v698_v17 = vld [vmem:[%s1076_s5] sm:$0xff]   ;;  %v858_v18 = vmov 0.0  }
 0x331   :  { %702 = vpow2.f32 %v340_v14 }
 0x332   :  { %v346_v21 = vmul.f32 1.442695, %v335_v19  ;;  %v348_v26 = vmul.f32 1.442695, %v336_v20  ;;  %v699_v19 = vld [vmem:[%s1076_s5 + $0x8] sm:$0xff]  }
 0x333   :  { %v328_v23 = vpop.xlane.xlu1 %327  ;;  %v325_v24 = vpop.xlane.xlu0 %324 }
 0x334   :  { %v338_v25 = vsub.f32 %v301_v0, %v328_v23  ;;  %704 = vpow2.f32 %v346_v21  ;;  %v337_v28 = vsub.f32 %v296_v1, %v325_v24 }
 0x335   :  { %706 = vpow2.f32 %v342_v22 }
 0x336   :  { %v352_v27 = vmul.f32 1.442695, %v338_v25  ;;  %v350_v37 = vmul.f32 1.442695, %v337_v28 }
 0x337   :  { %v401_v30 = vpop.permute.xlu1 %400  ;;  %v331_v33 = vpop.xlane.xlu0 %330 }
 0x338   :  { %708 = vpow2.f32 %v352_v27  ;;  %v339_v34 = vsub.f32 %v304_v5, %v331_v33  ;;  %651 = vmatprep.subr.bf16.mxu0 %v401_v30 }
 0x339   :  { %652 = vmatpush3.bf16.msra.mxu0 %v401_v30  ;;  %710 = vpow2.f32 %v348_v26 }
 0x33a   :  { %v1018_v35 = vpop.eup %700  ;;  %v354_v36 = vmul.f32 1.442695, %v339_v34 }
 0x33b   :  { %v362_v38 = vsel %vm307_vm1, %v1018_v35, 0.0  ;;  %v703_v39 = vpop.eup %702 }
 0x33c   :  { %712 = vpow2.f32 %v354_v36  ;;  %363 = vadd.xlane.f32.xlu1 %v362_v38  ;;  %v356_v41 = vsel %vm307_vm1, %v703_v39, 0.0  ;;  %v595_v38 = vld [vmem:[%s1077_s6] ss:$0 sm:$0xff] }
 0x33d   :  { %714 = vpow2.f32 %v350_v37 }
 0x33e   :  { %v705_v40 = vpop.eup %704 }
 0x33f   :  { %v365_v42 = vsel %vm307_vm1, %v705_v40, 0.0  ;;  %v707_v43 = vpop.eup %706 }
 0x340   :  { %357 = vadd.xlane.f32.xlu1 %v356_v41  ;;  %366 = vadd.xlane.f32.xlu0 %v365_v42  ;;  %v359_v47 = vsel %vm307_vm1, %v707_v43, 0.0 }
 0x342   :  { %v1024_v44 = vpop.eup %708 }
 0x343   :  { %v374_v45 = vsel %vm307_vm1, %v1024_v44, 0.0  ;;  %v711_v46 = vpop.eup %710 }
 0x344   :  { %375 = vadd.xlane.f32.xlu1 %v374_v45  ;;  %360 = vadd.xlane.f32.xlu0 %v359_v47  ;;  %v368_v49 = vsel %vm307_vm1, %v711_v46, 0.0 }
 0x346   :  { %v713_v48 = vpop.eup %712 }
 0x347   :  { %v377_v50 = vsel %vm307_vm1, %v713_v48, 0.0  ;;  %v715_v51 = vpop.eup %714 }
 0x348   :  { %369 = vadd.xlane.f32.xlu1 %v368_v49  ;;  %378 = vadd.xlane.f32.xlu0 %v377_v50  ;;  %v371_v52 = vsel %vm307_vm1, %v715_v51, 0.0 }
 0x34c   :  { %372 = vadd.xlane.f32.xlu0 %v371_v52 }
 0x359   :  { %404 = vrot.lane.b32.xlu1 %v980_v29, %s857_s28 }
 0x35d   :  { %406 = vrot.lane.b32.xlu1 %v984_v31, %s857_s28 }
 0x362   :  { %402 = vrot.lane.b32.xlu0 %v986_v32, %s857_s28 }
 0x3c9   :  { %v364_v53 = vpop.xlane.xlu1 %363 }
 0x3cd   :  { %v358_v54 = vpop.xlane.xlu1 %357  ;;  %v367_v55 = vpop.xlane.xlu0 %366 }
 0x3ce   :  { %716 = vrcp.f32 %v358_v54 }
 0x3d1   :  { %v376_v56 = vpop.xlane.xlu1 %375  ;;  %v361_v57 = vpop.xlane.xlu0 %360 }
 0x3d2   :  { %718 = vrcp.f32 %v361_v57 }
 0x3d3   :  { %720 = vrcp.f32 %v367_v55 }
 0x3d4   :  { %722 = vrcp.f32 %v364_v53 }
 0x3d5   :  { %v379_v58 = vpop.xlane.xlu0 %378  ;;  %v370_v59 = vpop.xlane.xlu1 %369 }
 0x3d6   :  { %724 = vrcp.f32 %v370_v59 }
 0x3d8   :  { %v717_v29 = vpop.eup %716 }
 0x3d9   :  { %v373_v60 = vpop.xlane.xlu0 %372  ;;  %v405_v31 = vpop.permute.xlu1 %404  ;;  %v388_v63 = vmul.f32 %v717_v29, %v703_v39 }
 0x3da   :  { %726 = vrcp.f32 %v373_v60 }
 0x3db   :  { %728 = vrcp.f32 %v379_v58 }
 0x3dc   :  { %v719_v61 = vpop.eup %718  ;;  %730 = vrcp.f32 %v376_v56 }
 0x3dd   :  { %v403_v62 = vpop.permute.xlu0 %402  ;;  %v389_v32 = vmul.f32 %v719_v61, %v707_v43  ;;  %v721_v1 = vpop.eup %720 }
 0x3de   :  { %653 = vmatprep.subr.bf16.mxu0 %v403_v62  ;;  %v723_v2 = vpop.eup %722  ;;  %v407_v4 = vpop.permute.xlu1 %406  ;;  %v391_v6 = vmul.f32 %v721_v1, %v705_v40 }
 0x3df   :  { %654 = vmatpush3.bf16.msra.mxu0 %v403_v62  ;;  %v396_v0 = vpack.c.bf16 %v389_v32, %v388_v63  ;;  %v390_v8 = vmul.f32 %v723_v2, %v1018_v35 }
 0x3e0   :  { %655 = vmatprep.subr.bf16.mxu0 %v405_v31  ;;  %v725_v3 = vpop.eup %724 }
 0x3e1   :  { %659 = vmatprep.mubr.msk.bf16.mxu0 %vm307_vm1, %v396_v0  ;;  %v392_v9 = vmul.f32 %v725_v3, %v711_v46  ;;  %v397_v10 = vpack.c.bf16 %v391_v6, %v390_v8 }
 0x3e3   :  { %656 = vmatpush3.bf16.msra.mxu0 %v405_v31 }
 0x3e4   :  { %v727_v5 = vpop.eup %726  ;;  %657 = vmatprep.subr.bf16.mxu0 %v407_v4 }
 0x3e5   :  { %v393_v7 = vmul.f32 %v727_v5, %v715_v51  ;;  %v729_v11 = vpop.eup %728 }
 0x3e6   :  { %v731_v13 = vpop.eup %730  ;;  %v395_v14 = vmul.f32 %v729_v11, %v713_v48 }
 0x3e7   :  { %658 = vmatpush3.bf16.msra.mxu0 %v407_v4  ;;  %v398_v12 = vpack.c.bf16 %v393_v7, %v392_v9  ;;  %v394_v15 = vmul.f32 %v731_v13, %v1024_v44 }
 0x3e8   :  { %667 = vmatprep.subr.bf16.mxu0 %v858_v18 }
 0x3e9   :  { %v399_v16 = vpack.c.bf16 %v395_v14, %v394_v15 }
 0x3ea   :  { %660 = vmatmul.mubr.msk.bf16.vlgmr.msra.gmra.mrb[4].mxu0 %vm307_vm1, %v397_v10 }
 0x3eb   :  { %663 = vmatprep.mubr.msk.bf16.mxu0 %vm307_vm1, %v398_v12  ;;  %668 = vmatpush3.bf16.msra.mxu0 %v698_v17 }
 0x3ec   :  { %669 = vmatprep.subr.bf16.mxu0 %v858_v18 }
 0x3ef   :  { %670 = vmatpush3.bf16.msra.mxu0 %v699_v19 }
 0x3f2   :  { %664 = vmatmul.mubr.msk.bf16.gmra.mrb[8].mxu0 %vm307_vm1, %v399_v16 }
 0x3f3   :  { %671 = vmatprep.mubr.msk.bf16.mxu0 %vm859_vm2, %v858_v18 }
 0x4bd   :  { %v661_v20 = vpop.f32.mrb[4].mxu0 }
 0x4be   :  { %v458_v21 = vpop.f32.mrb[5].mxu0 }
 0x4bf   :  { %v489_v22 = vadd.f32 %v661_v20, %v458_v21  ;;  %v662_v23 = vpop.f32.mrb[6].mxu0 }
 0x4c0   :  { %v461_v24 = vpop.f32.mrb[7].mxu0 }
 0x4c1   :  { %v490_v25 = vadd.f32 %v662_v23, %v461_v24 }
 0x4c5   :  { %v665_v26 = vpop.f32.mrb[8].mxu0 }
 0x4c6   :  { %v474_v27 = vpop.f32.mrb[9].mxu0 }
 0x4c7   :  { %v491_v28 = vadd.f32 %v489_v22, %v474_v27  ;;  %v666_v30 = vpop.f32.mrb[10].mxu0 }
 0x4c8   :  { %v477_v33 = vpop.f32.mrb[11].mxu0 }
 0x4c9   :  { %v493_v34 = vadd.f32 %v665_v26, %v491_v28  ;;  %v492_v35 = vadd.f32 %v490_v25, %v477_v33 }
 0x4cb   :  { %v494_v36 = vadd.f32 %v666_v30, %v492_v35 }
 0x4cd   :  { %v495_v37 = vpack.c.bf16 %v494_v36, %v493_v34 }
 0x4cf   :  { %672 = vmatmul.mubr.msk.bf16.vlgmr.msra.gmra.mrb[12].mxu0 %vm96_vm0, %v495_v37 }
 0x5a2   :  { %v556_v39 = vpop.f32.mrb[12].mxu0 }
 0x5a3   :  { %v557_v40 = vadd.f32 %v595_v38, %v556_v39  ;;  %v673_v41 = vpop.f32.mrb[13].mxu0 }
 0x5a4   :  { %v559_v42 = vpop.f32.mrb[14].mxu0 }
 0x5a5   :  { %563 = vst.msk [vmem:[#allocation10] sm:$0xff] %vm96_vm0, %v557_v40  ;;  %v560_v43 = vadd.f32 %v595_v38, %v559_v42  ;;  %v674_v44 = vpop.f32.mrb[15].mxu0 }
 0x5a7   :  { %564 = vst.msk [vmem:[#allocation10 + $0x8] sm:$0xff] %vm96_vm0, %v560_v43 }
 0x5a8   :  { %831 = shalt.err (!%p828_p8)
}
 0x5a9   :  { %s832_s0 = scalar_lea.hbm %s1078_s7, 256 }
 0x5aa   :  { %p833_p9 = scmp.ne.s32.totalorder %s1078_s7, %s832_s0  ;;  %p836_p10 = scmp.lt.u32.totalorder %s832_s0, %s1078_s7 }
 0x5ac   :  { %p838_p11 = pnand %p836_p10, %p833_p9 }
 0x5ae   :  { %841 = shalt.err (!%p838_p11)
}
 0x5af   :  { %576 = dma.vmem_to_hbm [thread:$0]  %s571_s12, 256, %s1078_s7, [#allocation4], %s852_s13, %s852_s13, %s853_s14  }
 0x5b0   :  { %848 = dma.done.wait [#allocation4], 256  }
 0x5b1   :  { %849 = vsyncadd [#allocation4], 4294967040 }
 0x5b2   :  { %580 = vsyncpa [#allocation3], 1 }
 0x5b3   :  { %581 = vsyncpa [#allocation6], 1 }
 0x5b4   :  { %582 = vsyncpa [#allocation9], 1 }
 0x5b5   :  { %583 = vsyncpa [#allocation4], 1 }

</bundles_post_ra>
